<compile_context>
chip_gen: v7x
topology: tpu7x:2x2x1
jax: 0.10.0
libtpu: 0.0.40
codegen_flags: <defaults>
</compile_context>

<pallas_src>
import math

import jax
import jax.numpy as jnp
from jax.experimental import pallas as pl
from jax.experimental.pallas import tpu as pltpu

CLAIM_DEFINITIONS_LEN = 12
ALPHA = 1.0   # CoDA default
BETA = 1.0    # CoDA default
LN_EPS = 1e-5

# bf16 operands with f32 accumulation -> native MXU path on v6e/v7x.
# Elementwise math (cdist, tanh/sigmoid, LayerNorm, conv MACs, IGM gates) stays f32.
MXU_DTYPE = jnp.bfloat16


def _sigmoid(x):
    # numerically stable sigmoid via tanh (EUP path), avoids exp overflow for very
    # negative CoDA N values.
    return 0.5 * (jnp.tanh(0.5 * x) + 1.0)


def _layer_norm(x, g, b, eps=LN_EPS):
    mu = jnp.mean(x, axis=-1, keepdims=True)
    var = jnp.mean((x - mu) ** 2, axis=-1, keepdims=True)
    return (x - mu) * jax.lax.rsqrt(var + eps) * g + b


def _seq_tile(n, target=512):
    # Keep tiles large (>=512 where possible): the IGM multiply is purely HBM-bound.
    for c in (target, 256, 128, 64, 32, 16, 8):
        if c <= n and n % c == 0:
            return c
    return n


def _cdist_seq_tile(S_enc, S_def, CH, budget=2 * 1024 * 1024):
    # S_enc tile for the CoDA kernel: the (S_def, TS, CH) f32 cdist broadcast temp must
    # stay within ~2 MiB.  Tiles are multiples of 16 (bf16 sublane packing) unless the
    # tile spans the whole S_enc axis.
    cands = [c for c in (512, 256, 128, 64, 32, 16) if c < S_enc and S_enc % c == 0]
    for c in cands:
        if S_def * c * CH * 4 <= budget:
            return c
    return cands[-1] if cands else S_enc


def _conv_seq_tile(S, max_cout, TD, budget=128 * 1024):
    # S tile for the conv stacks: keep the live (Cout, ST, TD) f32 accumulator at
    # roughly a quarter of the vreg file so the MAC chain stays in registers.
    for c in (64, 32, 16, 8):
        if c <= S and S % c == 0 and max_cout * c * TD * 4 <= budget:
            return c
    return S


def _vmem_limit(estimate_bytes):
    # Explicit scoped-VMEM budget (review item): block-size estimate + headroom,
    # clamped so it is valid on every generation (<= v7x's 64 MiB physical VMEM).
    return int(min(max(estimate_bytes + (4 << 20), 32 << 20), 64 << 20))


# ----------------------------------------------------------------------------
# CoDA attention kernel.
#   grid = (B, nd, S_enc // TS); q/k/v are pre-projected outside (k/v stored bf16).
#   The coda@v product is purely additive over S_enc (no softmax normalizer), so it is
#   accumulated in a VMEM scratch across the innermost 'arbitrary' grid axis; fc +
#   residual + LayerNorm run once at the last S_enc step.
# ----------------------------------------------------------------------------
def _coda_kernel(x_ref, q_ref, k_ref, v_ref, wfc_ref, bfc_ref, lng_ref, lnb_ref,
                 out_ref, acc_ref):
    s = pl.program_id(2)

    @pl.when(s == 0)
    def _():
        acc_ref[...] = jnp.zeros_like(acc_ref)

    q = q_ref[0, 0]                      # (S_def, D) f32 (hoisted projection)
    kc = k_ref[0]                        # (TS, D)   bf16
    vc = v_ref[0]                        # (TS, D)   bf16

    # E = alpha * q k^T on this S_enc tile (bf16 MXU operands, f32 accumulation).
    E = ALPHA * jax.lax.dot_general(
        q.astype(MXU_DTYPE), kc, (((1,), (1,)), ((), ())),
        preferred_element_type=jnp.float32)                     # (S_def, TS)

    # N = -beta * cdist_L1(q, k) on this tile, accumulated over D in 128-lane chunks:
    # the broadcast temp is (S_def, TS, CH) and stays within the VMEM budget.
    kf = kc.astype(jnp.float32)
    S_def, Dk = q.shape
    TS = kf.shape[0]
    CH = 128 if Dk % 128 == 0 else Dk
    dist = jnp.zeros((S_def, TS), jnp.float32)
    for c in range(0, Dk, CH):
        qc = q[:, c:c + CH]
        kcc = kf[:, c:c + CH]
        # NOTE(v6e/v7x): this abs-diff could run in bf16 for ~2x VPU throughput; kept
        # f32 for v5e portability (no bf16 VALU) and fidelity to the f32 PyTorch model.
        dist = dist + jnp.sum(jnp.abs(qc[:, None, :] - kcc[None, :, :]), axis=-1)
    N = -BETA * dist

    coda = jnp.tanh(E) * _sigmoid(N)
    acc_ref[...] += jnp.dot(coda.astype(MXU_DTYPE), vc,
                            preferred_element_type=jnp.float32)  # (S_def, D)

    @pl.when(s == pl.num_programs(2) - 1)
    def _():
        x = x_ref[0, 0]                  # residual (raw def-encoder output)
        # nn.Dropout(0.2) -> identity (eval); fc + residual + LayerNorm.
        y = jnp.dot(acc_ref[...].astype(MXU_DTYPE), wfc_ref[...],
                    preferred_element_type=jnp.float32) + bfc_ref[...]
        y = y + x
        mu = jnp.mean(y, axis=-1, keepdims=True)
        var = jnp.mean((y - mu) ** 2, axis=-1, keepdims=True)
        out_ref[0, 0] = ((y - mu) * jax.lax.rsqrt(var + LN_EPS)
                         * lng_ref[...] + lnb_ref[...])


def coda_attention(defx, q, kmat, vmat, p):
    # defx/q: (NUM_DEFS, B, S_def, D) f32; kmat/vmat: (B, S_enc, D) bf16 (pre-projected)
    nd, B, S_def, D = defx.shape
    _, S_enc, _ = kmat.shape
    CH = 128 if D % 128 == 0 else D
    TS = _cdist_seq_tile(S_enc, S_def, CH)
    n_s = S_enc // TS

    bytes_x = S_def * D * 4
    bytes_kv = TS * D * 2
    est = (2 * (2 * bytes_x + 2 * bytes_kv + D * D * 2 + 3 * D * 4)   # inputs (db)
           + 2 * bytes_x                                              # output (db)
           + bytes_x                                                  # acc scratch
           + 2 * S_def * TS * CH * 4)                                 # cdist temps

    const = lambda b, d, s: (0, 0)
    return pl.pallas_call(
        _coda_kernel,
        out_shape=jax.ShapeDtypeStruct((nd, B, S_def, D), jnp.float32),
        grid_spec=pltpu.PrefetchScalarGridSpec(
            num_scalar_prefetch=0,
            grid=(B, nd, n_s),
            in_specs=[
                pl.BlockSpec((1, 1, S_def, D), lambda b, d, s: (d, b, 0, 0)),  # x
                pl.BlockSpec((1, 1, S_def, D), lambda b, d, s: (d, b, 0, 0)),  # q
                pl.BlockSpec((1, TS, D), lambda b, d, s: (b, s, 0)),           # k (bf16)
                pl.BlockSpec((1, TS, D), lambda b, d, s: (b, s, 0)),           # v (bf16)
                # NOTE(v7x): these constant-index blocks never change; they could take
                # pipeline_mode=pl.Buffered(1) to drop their second VMEM buffer.
                pl.BlockSpec((D, D), const),
                pl.BlockSpec((1, D), const),
                pl.BlockSpec((1, D), const),
                pl.BlockSpec((1, D), const),
            ],
            out_specs=pl.BlockSpec((1, 1, S_def, D), lambda b, d, s: (d, b, 0, 0)),
            scratch_shapes=[pltpu.VMEM((S_def, D), jnp.float32)],
        ),
        compiler_params=pltpu.CompilerParams(
            dimension_semantics=("parallel", "parallel", "arbitrary"),
            vmem_limit_bytes=_vmem_limit(est)),
    )(defx, q, kmat, vmat, p["wfc_t"], p["bfc"], p["lng"], p["lnb"])


# ----------------------------------------------------------------------------
# Per-feature conv stacks.
#   grid = (B, D // TD), both 'parallel'; lane-dense D tiles, channels on a leading
#   axis.  The four layers stream through two ping-pong padded VMEM scratches; per
#   S tile the (Cout, ST, TD) accumulator stays near the vreg file, so the VPU MAC
#   chain is register-resident.  Only the zero "same"-padding margins are cleared.
# ----------------------------------------------------------------------------
def conv_stacks(x, p):
    # x: (nd, B, S, D)  (exactly the CoDA kernel output layout) -> out: (B, S, D)
    C0, B, S, D = x.shape
    TD = 128 if D % 128 == 0 else D
    ws = [p["w1"], p["w2"], p["w3"], p["w4"]]        # (K, Cin, Cout, D) each
    bs = [p["b1"], p["b2"], p["b3"], p["b4"]]        # (Cout, D) each
    PADL = 8                                         # sublane-aligned interior offset
    PADR = max(w.shape[0] // 2 for w in ws)
    CMAX = max([C0] + [w.shape[1] for w in ws] + [w.shape[2] for w in ws])
    max_cout = max(w.shape[2] for w in ws)
    ST = _conv_seq_tile(S, max_cout, TD)
    SPAD = PADL + S + PADR

    def kernel(x_ref, w1_ref, b1_ref, w2_ref, b2_ref, w3_ref, b3_ref, w4_ref, b4_ref,
               out_ref, pa, pb):
        # Zero only the pad margins (interiors are fully overwritten every step); the
        # zero margins provide "same" padding for every layer.
        for pr in (pa, pb):
            pr[:, 0:PADL, :] = jnp.zeros((CMAX, PADL, TD), jnp.float32)
            pr[:, PADL + S:SPAD, :] = jnp.zeros((CMAX, PADR, TD), jnp.float32)
        pa[0:C0, PADL:PADL + S, :] = x_ref[...][:, 0]                # (nd, S, TD)

        src, dst = pa, pb
        layer_refs = ((w1_ref, b1_ref), (w2_ref, b2_ref), (w3_ref, b3_ref),
                      (w4_ref, b4_ref))
        for li, (w_ref, b_ref) in enumerate(layer_refs):
            K, Cin, Cout = w_ref.shape[0], w_ref.shape[1], w_ref.shape[2]
            padk = K // 2
            last = li == len(layer_refs) - 1
            # TODO(synk): no nonlinearity between conv layers -- matches the original
            # PyTorch module (conv1..conv4 are chained directly).
            for st in range(0, S, ST):
                acc = jnp.zeros((Cout, ST, TD), jnp.float32)
                for k in range(K):
                    base = PADL - padk + k + st
                    for ci in range(Cin):
                        xs = src[ci, base:base + ST, :]              # (ST, TD)
                        wt = w_ref[k, ci]                            # (Cout, TD)
                        acc = acc + xs[None, :, :] * wt[:, None, :]
                acc = acc + b_ref[...][:, None, :]
                if last:                                             # final Cout == 1
                    out_ref[0, st:st + ST, :] = acc[0]
                else:
                    dst[0:Cout, PADL + st:PADL + st + ST, :] = acc
            src, dst = dst, src

    def wspec(w):
        return pl.BlockSpec(tuple(w.shape[:3]) + (TD,), lambda b, dt: (0, 0, 0, dt))

    def bspec(b):
        return pl.BlockSpec((b.shape[0], TD), lambda bb, dt: (0, dt))

    in_specs = [pl.BlockSpec((C0, 1, S, TD), lambda b, dt: (0, b, 0, dt))]
    for w, b in zip(ws, bs):
        in_specs += [wspec(w), bspec(b)]

    wbytes = sum(math.prod(w.shape[:3]) * TD * 4 for w in ws)
    bbytes = sum(w.shape[2] * TD * 4 for w in ws)
    est = (2 * (C0 * S * TD * 4 + wbytes + bbytes) + 2 * S * TD * 4
           + 2 * CMAX * SPAD * TD * 4)

    return pl.pallas_call(
        kernel,
        out_shape=jax.ShapeDtypeStruct((B, S, D), jnp.float32),
        grid_spec=pltpu.PrefetchScalarGridSpec(
            num_scalar_prefetch=0,
            grid=(B, D // TD),
            in_specs=in_specs,
            out_specs=pl.BlockSpec((1, S, TD), lambda b, dt: (b, 0, dt)),
            scratch_shapes=[pltpu.VMEM((CMAX, SPAD, TD), jnp.float32),
                            pltpu.VMEM((CMAX, SPAD, TD), jnp.float32)],
        ),
        compiler_params=pltpu.CompilerParams(
            dimension_semantics=("parallel", "parallel"),
            vmem_limit_bytes=_vmem_limit(est)),
    )(x, ws[0], bs[0], ws[1], bs[1], ws[2], bs[2], ws[3], bs[3])


# ----------------------------------------------------------------------------
# IGM: tiny gate in plain JAX, tiled grid-parallel Pallas kernel for the
# (B, S_enc, D) broadcast-multiply (pipelined; both grid axes 'parallel').
# ----------------------------------------------------------------------------
def _igm_interact(enc, conv_out, p):
    p1 = jnp.max(enc, axis=1)        # (B, D)
    p2 = jnp.max(conv_out, axis=1)   # (B, D)
    mu_c = _sigmoid(p1 @ p["w_c1"].T + p2 @ p["w_c2"].T + p["b_mu_c"])
    conflict = jnp.tanh((mu_c * p1) @ p["w_c3"].T
                        + ((1.0 - mu_c) * p2) @ p["w_c4"].T + p["b_c"])
    mu_r = _sigmoid(p1 @ p["w_r1"].T + p2 @ p["w_r2"].T + p["b_mu_r"])
    refine = jnp.tanh((mu_r * p1) @ p["w_r3"].T + (mu_r * p2) @ p["w_r4"].T + p["b_r"])
    adapt = refine + (1.0 - mu_r) * conflict
    return jnp.tanh(adapt @ p["w_a"].T + p["b_a"])               # (B, D)


def _igm_scale_kernel(g_ref, enc_ref, out_ref):
    out_ref[...] = g_ref[...] * enc_ref[...]


def igm(enc, conv_out, p):
    B, S_enc, D = enc.shape
    interact = _igm_interact(enc, conv_out, p)[:, None, :]       # (B, 1, D)
    TS = _seq_tile(S_enc)
    return pl.pallas_call(
        _igm_scale_kernel,
        out_shape=jax.ShapeDtypeStruct((B, S_enc, D), jnp.float32),
        grid_spec=pltpu.PrefetchScalarGridSpec(
            num_scalar_prefetch=0,
            grid=(B, S_enc // TS),
            in_specs=[
                pl.BlockSpec((1, 1, D), lambda b, s: (b, 0, 0)),
                pl.BlockSpec((1, TS, D), lambda b, s: (b, s, 0)),
            ],
            out_specs=pl.BlockSpec((1, TS, D), lambda b, s: (b, s, 0)),
        ),
        compiler_params=pltpu.CompilerParams(
            dimension_semantics=("parallel", "parallel")),
    )(interact, enc)


# ----------------------------------------------------------------------------
# def_encoder (plain JAX glue)
# ----------------------------------------------------------------------------
def transformer_encoder(params, x, num_heads=4):
    # TODO(synk): `TransformerEncoder` is not defined in the reference source; implemented a
    # standard 2-layer post-LN encoder (4-head MHA + ReLU FFN, dim_ff = d_model) in plain JAX
    # and treat `self.def_encoder(x)[-1]` as the final layer's hidden states.
    N, S, D = x.shape
    H = num_heads
    Dh = D // H

    def lin(h, w, b):
        return jnp.dot(h.astype(MXU_DTYPE), w.T.astype(MXU_DTYPE),
                       preferred_element_type=jnp.float32) + b

    for lp in params["layers"]:
        q = lin(x, lp["wq"], lp["bq"]).reshape(N, S, H, Dh).transpose(0, 2, 1, 3)
        k = lin(x, lp["wk"], lp["bk"]).reshape(N, S, H, Dh).transpose(0, 2, 1, 3)
        v = lin(x, lp["wv"], lp["bv"]).reshape(N, S, H, Dh).transpose(0, 2, 1, 3)
        s = jnp.einsum("nhqd,nhkd->nhqk", q, k) / math.sqrt(Dh)
        a = jax.nn.softmax(s, axis=-1)
        o = jnp.einsum("nhqk,nhkd->nhqd", a, v).transpose(0, 2, 1, 3).reshape(N, S, D)
        o = lin(o, lp["wo"], lp["bo"])
        x = _layer_norm(x + o, lp["ln1_g"], lp["ln1_b"])
        f = lin(jax.nn.relu(lin(x, lp["w1"], lp["b1"])), lp["w2"], lp["b2"])
        x = _layer_norm(x + f, lp["ln2_g"], lp["ln2_b"])
    return x


# ----------------------------------------------------------------------------
# Full DescNet forward
# ----------------------------------------------------------------------------
def descnet_forward(params, encoder_output, definition_inputs):
    B, nd, S_def, D = definition_inputs.shape
    # definition_inputs.permute(1,0,2,3) then def_encoder per definition (shared weights)
    defs = jnp.transpose(definition_inputs, (1, 0, 2, 3)).reshape(nd * B, S_def, D)
    defs = transformer_encoder(params["def_encoder"], defs)
    defx = defs.reshape(nd, B, S_def, D)

    cp = params["coda"]
    # q/k/v projections hoisted out of the kernel: one large-M MXU matmul each (review
    # item).  k/v are stored bf16 to halve their VMEM footprint and HBM DMA in-kernel.
    q = jnp.dot(defs.reshape(nd * B * S_def, D).astype(MXU_DTYPE), cp["wq_t"],
                preferred_element_type=jnp.float32).reshape(nd, B, S_def, D)
    kmat = jnp.dot(encoder_output.astype(MXU_DTYPE), cp["wk_t"],
                   preferred_element_type=jnp.float32).astype(MXU_DTYPE)
    vmat = jnp.dot(encoder_output.astype(MXU_DTYPE), cp["wv_t"],
                   preferred_element_type=jnp.float32).astype(MXU_DTYPE)

    attn = coda_attention(defx, q, kmat, vmat, cp)     # (nd, B, S_def, D)

    # Conv stacks consume the CoDA output layout directly and emit (B, S_def, D):
    # no HBM transposes.  Original loops over range(768) == dim_model; generalized to D.
    conv_out = conv_stacks(attn, params["conv"])       # (B, S_def, D)

    # dropout_1 / dropout_2 (eval) -> identity
    return igm(encoder_output, conv_out, params["igm"])


# ----------------------------------------------------------------------------
# Deterministic parameter initialization (synthetic, matches __init__ shapes)
# ----------------------------------------------------------------------------
def init_params(key, D, nd=CLAIM_DEFINITIONS_LEN,
                conv1_C=CLAIM_DEFINITIONS_LEN, conv1_K=5,
                conv2_C=CLAIM_DEFINITIONS_LEN, conv2_K=3,
                conv3_C=CLAIM_DEFINITIONS_LEN // 2, conv3_K=7,
                conv4_C=1, conv4_K=7):
    keys = iter(jax.random.split(key, 256))

    def u(shape, scale):
        return jax.random.uniform(next(keys), shape, jnp.float32, -scale, scale)

    def linear(out_d, in_d, bias=True):
        s = 1.0 / math.sqrt(in_d)
        w = u((out_d, in_d), s)
        return (w, u((out_d,), s)) if bias else w

    # def_encoder: 2 layers, 4 heads, dim_ff = D
    layers = []
    for _ in range(2):
        lp = {}
        for nm in ("q", "k", "v", "o"):
            w, b = linear(D, D)
            lp[f"w{nm}"], lp[f"b{nm}"] = w, b
        w1, b1 = linear(D, D)
        w2, b2 = linear(D, D)
        lp.update(w1=w1, b1=b1, w2=w2, b2=b2,
                  ln1_g=jnp.ones((D,), jnp.float32), ln1_b=jnp.zeros((D,), jnp.float32),
                  ln2_g=jnp.ones((D,), jnp.float32), ln2_b=jnp.zeros((D,), jnp.float32))
        layers.append(lp)
    def_encoder = {"layers": layers}

    # CoDA: bias-free q/k/v transforms + fc (with bias) + LayerNorm.  Stored
    # pre-transposed (in, out) in the MXU dtype (bf16): no in-kernel weight transpose
    # and halved HBM->VMEM weight traffic.
    s = 1.0 / math.sqrt(D)
    coda = {"wq_t": u((D, D), s).astype(MXU_DTYPE),
            "wk_t": u((D, D), s).astype(MXU_DTYPE),
            "wv_t": u((D, D), s).astype(MXU_DTYPE),
            "wfc_t": u((D, D), s).astype(MXU_DTYPE),
            "bfc": u((1, D), s),
            "lng": jnp.ones((1, D), jnp.float32),
            "lnb": jnp.zeros((1, D), jnp.float32)}

    # Conv stacks: one independent Conv2d chain per feature i (i < D); weights stored
    # tap-major / channel layout (K, Cin, Cout, D) with D on lanes.
    def conv_bank(cout, cin, K):
        sc = 1.0 / math.sqrt(cin * K)
        return u((K, cin, cout, D), sc), u((cout, D), sc)

    w1c, b1c = conv_bank(conv1_C, nd, conv1_K)
    w2c, b2c = conv_bank(conv2_C, conv1_C, conv2_K)
    w3c, b3c = conv_bank(conv3_C, conv2_C, conv3_K)
    w4c, b4c = conv_bank(conv4_C, conv3_C, conv4_K)
    conv = dict(w1=w1c, b1=b1c, w2=w2c, b2=b2c, w3=w3c, b3=b3c, w4=w4c, b4=b4c)

    # IGM
    igm_p = {}
    for nm in ("w_c1", "w_c2", "w_c3", "w_c4", "w_r1", "w_r2", "w_r3", "w_r4", "w_a"):
        igm_p[nm] = linear(D, D, bias=False)
    for nm in ("b_mu_c", "b_c", "b_mu_r", "b_r", "b_a"):
        igm_p[nm] = u((D,), math.sqrt(D))           # uniform_(-sqrt(dim), sqrt(dim))
    return {"def_encoder": def_encoder, "coda": coda, "conv": conv, "igm": igm_p}


# ----------------------------------------------------------------------------
# Pure-JAX reference (mirrors the kernel numerics: same bf16 cast points, f32 accum)
# ----------------------------------------------------------------------------
def _conv_same_ref(x, w, b):
    # x: (Cin, B, S, D); w: (K, Cin, Cout, D); b: (Cout, D)
    K, Cin, Cout, _ = w.shape
    S = x.shape[2]
    pad = K // 2
    xp = jnp.pad(x, ((0, 0), (0, 0), (pad, pad), (0, 0)))
    acc = jnp.zeros((Cout,) + x.shape[1:], jnp.float32)
    for k in range(K):
        for cin in range(Cin):
            acc = acc + xp[cin, :, k:k + S, :][None] * w[k, cin][:, None, None, :]
    return acc + b[:, None, None, :]


def descnet_reference(params, encoder_output, definition_inputs):
    B, nd, S_def, D = definition_inputs.shape
    defs = jnp.transpose(definition_inputs, (1, 0, 2, 3)).reshape(nd * B, S_def, D)
    defs = transformer_encoder(params["def_encoder"], defs).reshape(nd, B, S_def, D)

    cp = params["coda"]
    k_bf = jnp.dot(encoder_output.astype(MXU_DTYPE), cp["wk_t"],
                   preferred_element_type=jnp.float32).astype(MXU_DTYPE)
    v_bf = jnp.dot(encoder_output.astype(MXU_DTYPE), cp["wv_t"],
                   preferred_element_type=jnp.float32).astype(MXU_DTYPE)
    k_f = k_bf.astype(jnp.float32)
    outs = []
    for d in range(nd):
        x = defs[d]
        q = jnp.dot(x.astype(MXU_DTYPE), cp["wq_t"], preferred_element_type=jnp.float32)
        E = ALPHA * jnp.einsum("bqd,bkd->bqk", q.astype(MXU_DTYPE), k_bf,
                               preferred_element_type=jnp.float32)
        N = -BETA * jnp.sum(jnp.abs(q[:, :, None, :] - k_f[:, None, :, :]), axis=-1)
        coda = jnp.tanh(E) * _sigmoid(N)
        attn = jnp.einsum("bqk,bkd->bqd", coda.astype(MXU_DTYPE), v_bf,
                          preferred_element_type=jnp.float32)
        y = jnp.dot(attn.astype(MXU_DTYPE), cp["wfc_t"],
                    preferred_element_type=jnp.float32) + cp["bfc"]
        outs.append(_layer_norm(y + x, cp["lng"], cp["lnb"]))
    attn_all = jnp.stack(outs)                         # (nd, B, S_def, D)

    cv = params["conv"]
    y = attn_all
    for wk_, bk_ in ((cv["w1"], cv["b1"]), (cv["w2"], cv["b2"]),
                     (cv["w3"], cv["b3"]), (cv["w4"], cv["b4"])):
        y = _conv_same_ref(y, wk_, bk_)
    conv_out = y[0]                                    # (B, S_def, D)

    interact = _igm_interact(encoder_output, conv_out, params["igm"])
    return interact[:, None, :] * encoder_output


if __name__ == "__main__":
    B, S_enc, S_def, D = 2, 8, 8, 32        # small shapes (original uses D = 768)
    nd = CLAIM_DEFINITIONS_LEN

    key = jax.random.PRNGKey(0)
    kp, ke, kd = jax.random.split(key, 3)
    params = init_params(kp, D)
    encoder_output = jax.random.normal(ke, (B, S_enc, D), jnp.float32)
    definition_inputs = jax.random.normal(kd, (B, nd, S_def, D), jnp.float32)

    out = jax.block_until_ready(descnet_forward(params, encoder_output, definition_inputs))
    ref = jax.block_until_ready(descnet_reference(params, encoder_output, definition_inputs))

    assert out.shape == (B, S_enc, D), out.shape
    assert bool(jnp.all(jnp.isfinite(out)))
    if not jnp.allclose(out, ref, atol=5e-3, rtol=5e-3):
        err = float(jnp.max(jnp.abs(out - ref)))
        raise AssertionError(f"Pallas output mismatches pure-JAX reference (max err {err})")
    print("KERNEL_OK")
</pallas_src>

<mosaic_0001>
module attributes {stable_mosaic.version = 11 : i64} {
  func.func @_coda_kernel(%arg0: i32, %arg1: i32, %arg2: i32, %arg3: memref<1x1x8x32xf32, #tpu.memory_space<vmem>>, %arg4: memref<1x1x8x32xf32, #tpu.memory_space<vmem>>, %arg5: memref<1x8x32xbf16, #tpu.memory_space<vmem>>, %arg6: memref<1x8x32xbf16, #tpu.memory_space<vmem>>, %arg7: memref<32x32xbf16, #tpu.memory_space<vmem>>, %arg8: memref<1x32xf32, #tpu.memory_space<vmem>>, %arg9: memref<1x32xf32, #tpu.memory_space<vmem>>, %arg10: memref<1x32xf32, #tpu.memory_space<vmem>>, %arg11: memref<1x1x8x32xf32, #tpu.memory_space<vmem>>, %arg12: memref<8x32xf32, #tpu.memory_space<vmem>>) attributes {dimension_semantics = [#tpu.dimension_semantics<parallel>, #tpu.dimension_semantics<parallel>, #tpu.dimension_semantics<arbitrary>], iteration_bounds = array<i64: 2, 12, 1>, scalar_prefetch = 0 : i64, scratch_operands = 1 : i64, tpu.core_type = #tpu.core_type<tc>, window_params = [{transform_indices = @transform_0, window_bounds = array<i64: 1, 1, 8, 32>}, {transform_indices = @transform_1, window_bounds = array<i64: 1, 1, 8, 32>}, {transform_indices = @transform_2, window_bounds = array<i64: 1, 8, 32>}, {transform_indices = @transform_3, window_bounds = array<i64: 1, 8, 32>}, {pipeline_mode = #tpu.pipeline_mode<synchronous>, transform_indices = @transform_4, window_bounds = array<i64: 32, 32>}, {pipeline_mode = #tpu.pipeline_mode<synchronous>, transform_indices = @transform_5, window_bounds = array<i64: 1, 32>}, {pipeline_mode = #tpu.pipeline_mode<synchronous>, transform_indices = @transform_6, window_bounds = array<i64: 1, 32>}, {pipeline_mode = #tpu.pipeline_mode<synchronous>, transform_indices = @transform_7, window_bounds = array<i64: 1, 32>}, {transform_indices = @transform_8, window_bounds = array<i64: 1, 1, 8, 32>}]} {
    %c0_i32 = arith.constant 0 : i32
    %0 = arith.cmpi eq, %arg2, %c0_i32 : i32
    %1 = arith.extui %0 : i1 to i32
    %c0_i32_0 = arith.constant 0 : i32
    %2 = arith.cmpi ne, %1, %c0_i32_0 : i32
    scf.if %2 {
      %cst_24 = arith.constant 0.000000e+00 : f32
      %42 = vector.broadcast %cst_24 : f32 to vector<8x32xf32>
      %c0_25 = arith.constant 0 : index
      %c0_26 = arith.constant 0 : index
      %43 = vector.load %arg12[%c0_25, %c0_26] : memref<8x32xf32, #tpu.memory_space<vmem>>, vector<8x32xf32>
      tpu.vector_store %arg12[%c0_25, %c0_26], %42 {strides = array<i32>} : memref<8x32xf32, #tpu.memory_space<vmem>>, vector<8x32xf32>,
    } else {
    }
    %c0 = arith.constant 0 : index
    %c0_1 = arith.constant 0 : index
    %c0_2 = arith.constant 0 : index
    %c0_3 = arith.constant 0 : index
    %3 = vector.load %arg4[%c0, %c0_1, %c0_2, %c0_3] : memref<1x1x8x32xf32, #tpu.memory_space<vmem>>, vector<1x1x8x32xf32>
    %4 = vector.shape_cast %3 : vector<1x1x8x32xf32> to vector<8x32xf32>
    %c0_4 = arith.constant 0 : index
    %c0_5 = arith.constant 0 : index
    %c0_6 = arith.constant 0 : index
    %5 = vector.load %arg5[%c0_4, %c0_5, %c0_6] : memref<1x8x32xbf16, #tpu.memory_space<vmem>>, vector<1x8x32xbf16>
    %6 = vector.shape_cast %5 : vector<1x8x32xbf16> to vector<8x32xbf16>
    %c0_7 = arith.constant 0 : index
    %c0_8 = arith.constant 0 : index
    %c0_9 = arith.constant 0 : index
    %7 = vector.load %arg6[%c0_7, %c0_8, %c0_9] : memref<1x8x32xbf16, #tpu.memory_space<vmem>>, vector<1x8x32xbf16>
    %8 = vector.shape_cast %7 : vector<1x8x32xbf16> to vector<8x32xbf16>
    %9 = arith.truncf %4 : vector<8x32xf32> to vector<8x32xbf16>
    %cst = arith.constant dense<0.000000e+00> : vector<8x8xf32>
    %10 = tpu.matmul %9, %6, %cst {dimension_numbers = #tpu.dot_dimension_numbers<[1], [1], [0], [0], [0, 0, 1, 0], [], []>} : vector<8x32xbf16>, vector<8x32xbf16>, vector<8x8xf32> -> vector<8x8xf32>
    %cst_10 = arith.constant 1.000000e+00 : f32
    %11 = vector.broadcast %cst_10 : f32 to vector<8x8xf32>
    %12 = arith.mulf %11, %10 : vector<8x8xf32>
    %13 = arith.extf %6 : vector<8x32xbf16> to vector<8x32xf32>
    %cst_11 = arith.constant 0.000000e+00 : f32
    %14 = vector.broadcast %cst_11 : f32 to vector<8x8xf32>
    %15 = vector.shape_cast %4 : vector<8x32xf32> to vector<8x1x32xf32>
    %16 = vector.shape_cast %13 : vector<8x32xf32> to vector<1x8x32xf32>
    %17 = vector.broadcast %15 : vector<8x1x32xf32> to vector<8x8x32xf32>
    %18 = vector.broadcast %16 : vector<1x8x32xf32> to vector<8x8x32xf32>
    %19 = arith.subf %17, %18 : vector<8x8x32xf32>
    %20 = math.absf %19 : vector<8x8x32xf32>
    %cst_12 = arith.constant dense<0.000000e+00> : vector<8x8xf32>
    %21 = vector.multi_reduction <add>, %20, %cst_12 [2] : vector<8x8x32xf32> to vector<8x8xf32>
    %22 = arith.addf %14, %21 : vector<8x8xf32>
    %cst_13 = arith.constant -1.000000e+00 : f32
    %23 = vector.broadcast %cst_13 : f32 to vector<8x8xf32>
    %24 = arith.mulf %23, %22 : vector<8x8xf32>
    %25 = math.tanh %12 : vector<8x8xf32>
    %cst_14 = arith.constant 5.000000e-01 : f32
    %26 = vector.broadcast %cst_14 : f32 to vector<8x8xf32>
    %27 = arith.mulf %26, %24 : vector<8x8xf32>
    %28 = math.tanh %27 : vector<8x8xf32>
    %cst_15 = arith.constant 1.000000e+00 : f32
    %29 = vector.broadcast %cst_15 : f32 to vector<8x8xf32>
    %30 = arith.addf %28, %29 : vector<8x8xf32>
    %cst_16 = arith.constant 5.000000e-01 : f32
    %31 = vector.broadcast %cst_16 : f32 to vector<8x8xf32>
    %32 = arith.mulf %31, %30 : vector<8x8xf32>
    %33 = arith.mulf %25, %32 : vector<8x8xf32>
    %c0_17 = arith.constant 0 : index
    %c0_18 = arith.constant 0 : index
    %34 = vector.load %arg12[%c0_17, %c0_18] : memref<8x32xf32, #tpu.memory_space<vmem>>, vector<8x32xf32>
    %35 = arith.truncf %33 : vector<8x8xf32> to vector<8x8xbf16>
    %cst_19 = arith.constant dense<0.000000e+00> : vector<8x32xf32>
    %36 = tpu.matmul %35, %8, %cst_19 {dimension_numbers = #tpu.dot_dimension_numbers<[1], [0], [0], [1], [0, 0, 1, 1], [], []>} : vector<8x8xbf16>, vector<8x32xbf16>, vector<8x32xf32> -> vector<8x32xf32>
    %37 = arith.addf %34, %36 : vector<8x32xf32>
    %c0_20 = arith.constant 0 : index
    %c0_21 = arith.constant 0 : index
    %38 = vector.load %arg12[%c0_20, %c0_21] : memref<8x32xf32, #tpu.memory_space<vmem>>, vector<8x32xf32>
    tpu.vector_store %arg12[%c0_20, %c0_21], %37 {strides = array<i32>} : memref<8x32xf32, #tpu.memory_space<vmem>>, vector<8x32xf32>,
    %c0_i32_22 = arith.constant 0 : i32
    %39 = arith.cmpi eq, %arg2, %c0_i32_22 : i32
    %40 = arith.extui %39 : i1 to i32
    %c0_i32_23 = arith.constant 0 : i32
    %41 = arith.cmpi ne, %40, %c0_i32_23 : i32
    scf.if %41 {
      %c0_24 = arith.constant 0 : index
      %c0_25 = arith.constant 0 : index
      %c0_26 = arith.constant 0 : index
      %c0_27 = arith.constant 0 : index
      %42 = vector.load %arg3[%c0_24, %c0_25, %c0_26, %c0_27] : memref<1x1x8x32xf32, #tpu.memory_space<vmem>>, vector<1x1x8x32xf32>
      %43 = vector.shape_cast %42 : vector<1x1x8x32xf32> to vector<8x32xf32>
      %c0_28 = arith.constant 0 : index
      %c0_29 = arith.constant 0 : index
      %44 = vector.load %arg12[%c0_28, %c0_29] : memref<8x32xf32, #tpu.memory_space<vmem>>, vector<8x32xf32>
      %45 = arith.truncf %44 : vector<8x32xf32> to vector<8x32xbf16>
      %c0_30 = arith.constant 0 : index
      %c0_31 = arith.constant 0 : index
      %46 = vector.load %arg7[%c0_30, %c0_31] : memref<32x32xbf16, #tpu.memory_space<vmem>>, vector<32x32xbf16>
      %cst_32 = arith.constant dense<0.000000e+00> : vector<8x32xf32>
      %47 = tpu.matmul %45, %46, %cst_32 {dimension_numbers = #tpu.dot_dimension_numbers<[1], [0], [0], [1], [0, 0, 1, 1], [], []>} : vector<8x32xbf16>, vector<32x32xbf16>, vector<8x32xf32> -> vector<8x32xf32>
      %c0_33 = arith.constant 0 : index
      %c0_34 = arith.constant 0 : index
      %48 = vector.load %arg8[%c0_33, %c0_34] : memref<1x32xf32, #tpu.memory_space<vmem>>, vector<1x32xf32>
      %49 = vector.broadcast %48 : vector<1x32xf32> to vector<8x32xf32>
      %50 = arith.addf %47, %49 : vector<8x32xf32>
      %51 = arith.addf %50, %43 : vector<8x32xf32>
      %cst_35 = arith.constant dense<0.000000e+00> : vector<8xf32>
      %52 = vector.multi_reduction <add>, %51, %cst_35 [1] : vector<8x32xf32> to vector<8xf32>
      %53 = vector.shape_cast %52 : vector<8xf32> to vector<8x1xf32>
      %cst_36 = arith.constant 3.200000e+01 : f32
      %54 = vector.broadcast %cst_36 : f32 to vector<8x1xf32>
      %55 = arith.divf %53, %54 : vector<8x1xf32>
      %56 = vector.broadcast %55 : vector<8x1xf32> to vector<8x32xf32>
      %57 = arith.subf %51, %56 : vector<8x32xf32>
      %58 = arith.mulf %57, %57 : vector<8x32xf32>
      %cst_37 = arith.constant dense<0.000000e+00> : vector<8xf32>
      %59 = vector.multi_reduction <add>, %58, %cst_37 [1] : vector<8x32xf32> to vector<8xf32>
      %60 = vector.shape_cast %59 : vector<8xf32> to vector<8x1xf32>
      %cst_38 = arith.constant 3.200000e+01 : f32
      %61 = vector.broadcast %cst_38 : f32 to vector<8x1xf32>
      %62 = arith.divf %60, %61 : vector<8x1xf32>
      %63 = vector.broadcast %55 : vector<8x1xf32> to vector<8x32xf32>
      %64 = arith.subf %51, %63 : vector<8x32xf32>
      %cst_39 = arith.constant 9.99999974E-6 : f32
      %65 = vector.broadcast %cst_39 : f32 to vector<8x1xf32>
      %66 = arith.addf %62, %65 : vector<8x1xf32>
      %67 = math.rsqrt %66 : vector<8x1xf32>
      %68 = vector.broadcast %67 : vector<8x1xf32> to vector<8x32xf32>
      %69 = arith.mulf %64, %68 : vector<8x32xf32>
      %c0_40 = arith.constant 0 : index
      %c0_41 = arith.constant 0 : index
      %70 = vector.load %arg9[%c0_40, %c0_41] : memref<1x32xf32, #tpu.memory_space<vmem>>, vector<1x32xf32>
      %71 = vector.broadcast %70 : vector<1x32xf32> to vector<8x32xf32>
      %72 = arith.mulf %69, %71 : vector<8x32xf32>
      %c0_42 = arith.constant 0 : index
      %c0_43 = arith.constant 0 : index
      %73 = vector.load %arg10[%c0_42, %c0_43] : memref<1x32xf32, #tpu.memory_space<vmem>>, vector<1x32xf32>
      %74 = vector.broadcast %73 : vector<1x32xf32> to vector<8x32xf32>
      %75 = arith.addf %72, %74 : vector<8x32xf32>
      %c0_44 = arith.constant 0 : index
      %c0_45 = arith.constant 0 : index
      %c0_46 = arith.constant 0 : index
      %c0_47 = arith.constant 0 : index
      %76 = vector.load %arg11[%c0_44, %c0_45, %c0_46, %c0_47] : memref<1x1x8x32xf32, #tpu.memory_space<vmem>>, vector<1x1x8x32xf32>
      %77 = vector.shape_cast %76 : vector<1x1x8x32xf32> to vector<8x32xf32>
      %78 = vector.shape_cast %75 : vector<8x32xf32> to vector<1x1x8x32xf32>
      tpu.vector_store %arg11[%c0_44, %c0_45, %c0_46, %c0_47], %78 {strides = array<i32>} : memref<1x1x8x32xf32, #tpu.memory_space<vmem>>, vector<1x1x8x32xf32>,
    } else {
    }
    return
  }
  func.func @transform_0(%arg0: i32, %arg1: i32, %arg2: i32) -> (i32, i32, i32, i32) {
    %c0_i32 = arith.constant 0 : i32
    %c0_i32_0 = arith.constant 0 : i32
    %c0_i32_1 = arith.constant 0 : i32
    return %arg1, %arg0, %c0_i32, %c0_i32_0 : i32, i32, i32, i32
  }
  func.func @transform_1(%arg0: i32, %arg1: i32, %arg2: i32) -> (i32, i32, i32, i32) {
    %c0_i32 = arith.constant 0 : i32
    %c0_i32_0 = arith.constant 0 : i32
    %c0_i32_1 = arith.constant 0 : i32
    return %arg1, %arg0, %c0_i32, %c0_i32_0 : i32, i32, i32, i32
  }
  func.func @transform_2(%arg0: i32, %arg1: i32, %arg2: i32) -> (i32, i32, i32) {
    %c0_i32 = arith.constant 0 : i32
    %c0_i32_0 = arith.constant 0 : i32
    return %arg0, %arg2, %c0_i32 : i32, i32, i32
  }
  func.func @transform_3(%arg0: i32, %arg1: i32, %arg2: i32) -> (i32, i32, i32) {
    %c0_i32 = arith.constant 0 : i32
    %c0_i32_0 = arith.constant 0 : i32
    return %arg0, %arg2, %c0_i32 : i32, i32, i32
  }
  func.func @transform_4(%arg0: i32, %arg1: i32, %arg2: i32) -> (i32, i32) {
    %c0_i32 = arith.constant 0 : i32
    %c0_i32_0 = arith.constant 0 : i32
    %c0_i32_1 = arith.constant 0 : i32
    return %c0_i32, %c0_i32_0 : i32, i32
  }
  func.func @transform_5(%arg0: i32, %arg1: i32, %arg2: i32) -> (i32, i32) {
    %c0_i32 = arith.constant 0 : i32
    %c0_i32_0 = arith.constant 0 : i32
    %c0_i32_1 = arith.constant 0 : i32
    return %c0_i32, %c0_i32_0 : i32, i32
  }
  func.func @transform_6(%arg0: i32, %arg1: i32, %arg2: i32) -> (i32, i32) {
    %c0_i32 = arith.constant 0 : i32
    %c0_i32_0 = arith.constant 0 : i32
    %c0_i32_1 = arith.constant 0 : i32
    return %c0_i32, %c0_i32_0 : i32, i32
  }
  func.func @transform_7(%arg0: i32, %arg1: i32, %arg2: i32) -> (i32, i32) {
    %c0_i32 = arith.constant 0 : i32
    %c0_i32_0 = arith.constant 0 : i32
    %c0_i32_1 = arith.constant 0 : i32
    return %c0_i32, %c0_i32_0 : i32, i32
  }
  func.func @transform_8(%arg0: i32, %arg1: i32, %arg2: i32) -> (i32, i32, i32, i32) {
    %c0_i32 = arith.constant 0 : i32
    %c0_i32_0 = arith.constant 0 : i32
    %c0_i32_1 = arith.constant 0 : i32
    return %arg1, %arg0, %c0_i32, %c0_i32_0 : i32, i32, i32, i32
  }
}

</mosaic_0001>

<bundles_post_ra>
// kernel: tpu_custom_call.1
= control target key start
LH: loop header
LB: loop body
LE: loop exit
PB: predicated region body
PF: predicated region fallthrough
CT: control target
= control target key end

     0   :  { %s2059_s0 = inlined_call_operand.hbm [shape: f32[12,2,8,32], index: 0, kind: input, shape index: {}]   ;;  %s2060_s1 = inlined_call_operand.hbm [shape: f32[12,2,8,32], index: 1, kind: input, shape index: {}]   ;;  %s2061_s2 = inlined_call_operand.hbm [shape: bf16[2,8,32], index: 2, kind: input, shape index: {}]   ;;  %s2062_s3 = inlined_call_operand.vmem [shape: bf16[2,8,32], index: 3, kind: input, shape index: {}]   ;;  %s2063_s4 = inlined_call_operand.hbm [shape: bf16[32,32], index: 4, kind: input, shape index: {}]   ;;  %s2064_s5 = inlined_call_operand.vmem [shape: f32[1,32], index: 5, kind: input, shape index: {}]   ;;  %s2065_s6 = inlined_call_operand.vmem [shape: f32[1,32], index: 6, kind: input, shape index: {}]   ;;  %s2066_s7 = inlined_call_operand.vmem [shape: f32[1,32], index: 7, kind: input, shape index: {}]   ;;  %s2067_s8 = inlined_call_operand.hbm [shape: f32[12,2,8,32], index: 8, kind: output, shape index: {}]  }
   0x1   :  { %2092 = sst [smem:[#allocation27_spill]] %s2060_s1 }
   0x2   :  { %2093 = sst [smem:[#allocation28_spill]] %s2062_s3 }
   0x3   :  { %2094 = sst [smem:[#allocation29_spill]] %s2064_s5 }
   0x4   :  { %2095 = sst [smem:[#allocation30_spill]] %s2065_s6 }
   0x5   :  { %2096 = sst [smem:[#allocation31_spill]] %s2066_s7 }
   0x6   :  { %2097 = sst [smem:[#allocation32_spill]] %s2067_s8 }
   0x7   :  { %13 = vsyncpa [#allocation4], 0 }
   0x8   :  { %15 = vsyncpa [#allocation4 + $0x1], 0 }
   0x9   :  { %16 = vsyncpa [#allocation7], 0 }
   0xa   :  { %18 = vsyncpa [#allocation7 + $0x1], 0 }
   0xb   :  { %19 = vsyncpa [#allocation10], 0 }
   0xc   :  { %20 = vsyncpa [#allocation5], 0 }
   0xd   :  { %22 = vsyncpa [#allocation5 + $0x1], 0  ;;  %s1614_s27 = smov 0   ;;  %s1616_s28 = smov 0  }
   0xe   :  { %s1618_s29 = smov 0   ;;  %s1620_s30 = smov 0  }
   0xf   :  { %s1622_s9 = smov 0   ;;  %s1624_s10 = smov 0  }
  0x10   :  { %s1626_s11 = smov 0   ;;  %s1628_s12 = smov 0  }
  0x11   :  { %s1630_s13 = smov 0   ;;  %s1632_s14 = smov 0  }
  0x12   :  { %s1634_s15 = smov 0  }
  0x13 LB: > { %2098 = sst [smem:[#allocation17_spill]] %s1529_s30  ;;  %s1670_s16 = sadd.s32 4294967295, %s1557_s15   ;;  %s1557_s15 = sphi %s1634_s15, %s28_s15   ;;  %s1553_s14 = sphi %s1632_s14, %s2158_s14   ;;  %s1549_s13 = sphi %s1630_s13, %s2157_s13   ;;  %s1545_s12 = sphi %s1628_s12, %s2156_s12   ;;  %s1541_s11 = sphi %s1626_s11, %s2147_s11   ;;  %s1537_s10 = sphi %s1624_s10, %s2155_s10   ;;  %s1533_s9 = sphi %s1622_s9, %s2154_s9   ;;  %s1529_s30 = sphi %s1620_s30, %s2153_s30   ;;  %s1525_s29 = sphi %s1618_s29, %s2152_s29   ;;  %s1521_s28 = sphi %s1616_s28, %s2151_s28   ;;  %s1517_s27 = sphi %s1614_s27, %s2150_s27  }
  0x14   : > { %2099 = sst [smem:[#allocation18_spill]] %s1541_s11  ;;  %s1095_s17 = sadd.s32 4294967294, %s1557_s15  }
  0x15   : > { %2100 = sst [smem:[#allocation19_spill]] %s1545_s12  ;;  %s43_s18 = sadd.s32 1, %s1549_s13 }
  0x16   : > { %2101 = sst [smem:[#allocation20_spill]] %s1549_s13  ;;  %s47_s19 = sadd.s32 1, %s1553_s14 }
  0x17   : > { %p45_p0 = scmp.ge.s32.totalorder %s43_s18, 12  ;;  %s56_s20 = sadd.s32 1, %s1537_s10 }
  0x18   : > { %p63_p1 = scmp.ne.s32.totalorder %s1537_s10, %s1533_s9  ;;  %p2078_p2 = scmp.eq.s32.totalorder %s1557_s15, 0 }
  0x19   : > { %s2160_s18 = smov (%p45_p0, %s43_s18), 0  ;;  %s2162_s19 = smov (!%p45_p0, %s47_s19), %s1553_s14 }
  0x1a   : > { %2102 = sst [smem:[#allocation21_spill]] %s2160_s18  ;;  %s51_s21 = ssub.s32 %s1549_s13, %s2160_s18 }
  0x1b   : > { %p1686_p3 = por %p2078_p2, %p63_p1  ;;  %p49_p4 = scmp.ge.s32.totalorder %s2162_s19, 2 }
  0x1c   : > { %p2079_p5 = scmp.ne.s32.totalorder %s1533_s9, %s1529_s30  ;;  %p263_p6 = scmp.eq.s32.totalorder %s1670_s16, 23 }
  0x1d   : > { %p269_p7 = scmp.eq.s32.totalorder %s1095_s17, 23  ;;  %s2164_s19 = smov (%p49_p4, %s2162_s19), 0 }
  0x1e   : > { %2104 = sst [smem:[#allocation22_spill]] %s2164_s19  ;;  %p1695_p8 = por %p263_p6, %p63_p1 }
  0x1f   : > { %p1702_p9 = por %p269_p7, %p2079_p5  ;;  %s1708_s25 = ssub.s32 %s1553_s14, %s2164_s19 }
  0x20   : > { %s2105_s23 = scalar_select %p1695_p8, 1, 0 }
  0x21   : > { %s2107_s24 = scalar_select %p1702_p9, 1, 0 }
  0x22   : > { %2106 = sst [smem:[#allocation23_spill]] %s2105_s23  ;;  %s53_s26 = sor.u32 %s1708_s25, %s51_s21 }
  0x23   : > { %2108 = sst [smem:[#allocation24_spill]] %s2107_s24  ;;  %p54_p11 = scmp.eq.s32.totalorder %s53_s26, 0 }
  0x24   : > { %p2077_p12 = scmp.lt.s32.totalorder %s1557_s15, 24  ;;  %s2071_s17 = sand.u32 1, %s1537_s10  }
  0x25   : > { %s1715_s18 = scalar_select %p54_p11, %s1537_s10, %s56_s20  }
  0x26   : > { %s1719_s8 = sshll.u32 %s2071_s17, 3  ;;  %s1100_s7 = sshll.u32 %s1549_s13, 1 }
  0x27   : > { %2109 = sst [smem:[#allocation25_spill]] %s1715_s18  ;;  %s1723_s6 = sadd.s32 %s1553_s14, %s1100_s7 }
  0x28   : > { %p1729_p13 = pnand %p2077_p12, %p1686_p3  ;;  %s2074_s21 = sshll.u32 %s1723_s6, 7 }
  0x29   : > { %s331_s20 = sand.u32 1, %s1557_s15   ;;  %s2111_s1 = sld [smem:[#allocation27_spill]] }
  0x2a   : > { %s2110_s19 = scalar_select %p1729_p13, 1, 0 }
  0x2b   : > { %s335_s7 = scalar_lea.vmem [#allocation6], %s1719_s8  ;;  %s1745_s13 = scalar_lea.sflag [#allocation7], %s331_s20 }
  0x2c   : > { %s344_s22 = sshll.u32 %s335_s7, 4  ;;  %p2082_p1 = pneg %p1729_p13  ;;  %s1743_s22 = int_to_ptr.vmem [resolvable:$true] %s344_s22 }
  0x2f   : > { %s1740_s18 = scalar_lea.hbm %s2111_s1, %s2074_s21  ;;  %s1310_s21 = scalar_lea.hbm %s2111_s1, 3072 }
  0x30   : > { %s1305_s24 = scalar_lea.hbm %s1740_s18, 128  ;;  %p1311_p6 = scmp.lt.u32.totalorder %s1740_s18, %s2111_s1 }
  0x31   : > { %p1306_p0 = scmp.ne.s32.totalorder %s1740_s18, %s1305_s24  ;;  %p1312_p7 = scmp.lt.u32.totalorder %s1310_s21, %s1305_s24 }
  0x32   : > { %p1314_p12 = scmp.lt.u32.totalorder %s1305_s24, %s1740_s18 }
  0x33   : > { %p1308_p3 = pnand %p2082_p1, %p1306_p0  ;;  %p1313_p11 = por %p1312_p7, %p1311_p6 }
  0x35   : > { %p1309_p4 = pneg %p1308_p3  ;;  %p1315_p2 = por %p1314_p12, %p1313_p11 }
  0x37   : > { %p1316_p10 = pnand %p1315_p2, %p1309_p4 }
  0x39   : > { %1319 = shalt.err (!%p1316_p10)
}
  0x3a   : > { %s1320_s20 = scalar_lea.vmem %s1743_s22, 128  ;;  %s1559_s7 = smov [#allocation6]  }
  0x3b   : > { %p1321_p0 = scmp.ne.s32.totalorder %s1743_s22, %s1320_s20  ;;  %s1325_s17 = sshll.u32 %s1559_s7, 4  ;;  %s1326_s17 = int_to_ptr.vmem [resolvable:$false] %s1325_s17 }
  0x3c   : > { %s1327_s11 = scalar_lea.vmem %s1326_s17, 256  ;;  %p1328_p9 = scmp.lt.s32.totalorder %s1743_s22, %s1326_s17 }
  0x3d   : > { %p1323_p3 = pnand %p1321_p0, %p2082_p1  ;;  %p1329_p6 = scmp.lt.s32.totalorder %s1327_s11, %s1320_s20 }
  0x3f   : > { %p1324_p5 = pneg %p1323_p3  ;;  %p1330_p7 = por %p1329_p6, %p1328_p9 }
  0x41   : > { %p1331_p12 = pnand %p1330_p7, %p1324_p5 }
  0x43   : > { %1334 = shalt.err (!%p1331_p12)
}
  0x44   : > { %1176 = dma.hbm_to_vmem [thread:$0]  (!%p1729_p13), %s1740_s18, 128, %s1743_s22, %s1745_s13  }
  0x45   : > { %p2081_p2 = scmp.eq.s32.totalorder %s1670_s16, 0  ;;  %p1096_p10 = scmp.ge.s32.totalorder %s1557_s15, 1 }
  0x46   : > { %p276_p9 = scmp.lt.s32.totalorder %s1557_s15, 25  ;;  %p2112_p5 = scmp.ne.s32.totalorder %s1533_s9, %s1529_s30 }
  0x47   : > { %s1560_s24 = smov [#allocation9]   ;;  %s2116_s18 = sshll.u32 %s1723_s6, 7 }
  0x48   : > { %p1781_p4 = por %p2081_p2, %p2112_p5  ;;  %s288_s21 = sshll.u32 %s1560_s24, 4  ;;  %s1789_s21 = int_to_ptr.vmem [resolvable:$true] %s288_s21 }
  0x49   : > { %p1785_p11 = pnand %p1096_p10, %p276_p9  ;;  %s1798_s7 = scalar_lea.hbm %s2059_s0, %s2116_s18 }
  0x4a   : > { %s2113_s23 = scalar_select %p1781_p4, 1, 0 }
  0x4b   : > { %s2115_s26 = scalar_select %p1785_p11, 1, 0 }
  0x4c   : > { %2114 = sst [smem:[#allocation26_spill]] %s2113_s23  ;;  %p1166_p0 = pneg %p1785_p11 }
  0x4d   : > { %s315_s11 = scalar_lea.vmem [#allocation3], %s1719_s8  ;;  %s1335_s5 = scalar_lea.hbm %s2063_s4, 256 }
  0x4e   : > { %p1802_p3 = pnand %p1166_p0, %p2081_p2  ;;  %s324_s24 = sshll.u32 %s315_s11, 4  ;;  %s1807_s24 = int_to_ptr.vmem [resolvable:$true] %s324_s24 }
  0x4f   : > { %p1336_p6 = scmp.ne.s32.totalorder %s2063_s4, %s1335_s5  ;;  %p1342_p9 = scmp.lt.u32.totalorder %s1335_s5, %s2063_s4 }
  0x50   : > { %p1337_p7 = pneg %p1802_p3 }
  0x52   : > { %p1338_p12 = pnand %p1337_p7, %p1336_p6 }
  0x54   : > { %p1339_p10 = pneg %p1338_p12 }
  0x56   : > { %p1344_p5 = pnand %p1342_p9, %p1339_p10 }
  0x58   : > { %1347 = shalt.err (!%p1344_p5)
}
  0x59   : > { %s1348_s8 = scalar_lea.vmem %s1789_s21, 256  ;;  %p1356_p8 = scmp.lt.s32.totalorder %s1789_s21, %s1789_s21 }
  0x5a   : > { %p1349_p0 = scmp.ne.s32.totalorder %s1789_s21, %s1348_s8  ;;  %p1357_p4 = scmp.lt.s32.totalorder %s1348_s8, %s1348_s8 }
  0x5c   : > { %p1351_p2 = pnand %p1349_p0, %p1337_p7  ;;  %p1358_p11 = por %p1357_p4, %p1356_p8 }
  0x5e   : > { %p1352_p1 = pneg %p1351_p2 }
  0x60   : > { %p1359_p13 = pnand %p1358_p11, %p1352_p1 }
  0x62   : > { %1362 = shalt.err (!%p1359_p13)
}
  0x63   : > { %s1561_s1 = smov 64   ;;  %s1562_s3 = smov 4  }
  0x64   : > { %1169 = dma.hbm_to_vmem [thread:$0]  (!%p1802_p3), %s2063_s4, 256, %s1789_s21, [#allocation10], %s1561_s1, %s1561_s1, %s1562_s3  }
  0x65   : > { %s2118_s20 = sand.u32 1, %s1537_s10   ;;  %s1363_s6 = scalar_lea.hbm %s1798_s7, 128 }
  0x66   : > { %s312_s11 = scalar_lea.sflag [#allocation4], %s2118_s20  ;;  %p1364_p8 = scmp.ne.s32.totalorder %s1798_s7, %s1363_s6 }
  0x67   : > { %p2119_p13 = scmp.ne.s32.totalorder %s2110_s19, 0  ;;  %s1368_s8 = scalar_lea.hbm %s2059_s0, 3072 }
  0x68   : > { %p1369_p11 = scmp.lt.u32.totalorder %s1798_s7, %s2059_s0  ;;  %p1370_p6 = scmp.lt.u32.totalorder %s1368_s8, %s1363_s6 }
  0x69   : > { %p2120_p1 = pneg %p2119_p13  ;;  %p1372_p12 = scmp.lt.u32.totalorder %s1363_s6, %s1798_s7 }
  0x6a   : > { %p1371_p7 = por %p1370_p6, %p1369_p11 }
  0x6b   : > { %p1366_p2 = pnand %p1364_p8, %p2120_p1 }
  0x6c   : > { %p1373_p3 = por %p1372_p12, %p1371_p7 }
  0x6d   : > { %p1367_p4 = pneg %p1366_p2 }
  0x6f   : > { %p1374_p10 = pnand %p1373_p3, %p1367_p4 }
  0x71   : > { %1377 = shalt.err (!%p1374_p10)
}
  0x72   : > { %s1378_s21 = scalar_lea.vmem %s1807_s24, 128  ;;  %p2121_p5 = pmov %p2120_p1 }
  0x73   : > { %p1379_p9 = scmp.ne.s32.totalorder %s1807_s24, %s1378_s21  ;;  %s1563_s17 = smov [#allocation3]  }
  0x74   : > { %s1383_s1 = sshll.u32 %s1563_s17, 4  ;;  %s1384_s1 = int_to_ptr.vmem [resolvable:$false] %s1383_s1 }
  0x75   : > { %p1381_p0 = pnand %p1379_p9, %p2121_p5  ;;  %s1385_s12 = scalar_lea.vmem %s1384_s1, 256 }
  0x76   : > { %p1386_p1 = scmp.lt.s32.totalorder %s1807_s24, %s1384_s1  ;;  %p1387_p2 = scmp.lt.s32.totalorder %s1385_s12, %s1378_s21 }
  0x77   : > { %p1382_p8 = pneg %p1381_p0 }
  0x78   : > { %p1388_p11 = por %p1387_p2, %p1386_p1 }
  0x7a   : > { %p1389_p6 = pnand %p1388_p11, %p1382_p8 }
  0x7c   : > { %1392 = shalt.err (!%p1389_p6)
}
  0x7d   : > { %1173 = dma.hbm_to_vmem [thread:$0]  (!%p2119_p13), %s1798_s7, 128, %s1807_s24, %s312_s11  }
  0x7e   : > { %s112_s23 = sadd.s32 1, %s1525_s29  ;;  %p119_p4 = scmp.ne.s32.totalorder %s1525_s29, %s1521_s28 }
  0x7f   : > { %p2122_p7 = scmp.eq.s32.totalorder %s1708_s25, 0  ;;  %p2123_p12 = scmp.eq.s32.totalorder %s1557_s15, 0 }
  0x80   : > { %p125_p10 = scmp.ne.s32.totalorder %s1521_s28, %s1517_s27  ;;  %s353_s19 = sand.u32 1, %s1525_s29  }
  0x81   : > { %s1861_s3 = scalar_select %p2122_p7, %s1525_s29, %s112_s23  }
  0x82   : > { %p121_p3 = por %p119_p4, %p2123_p12  ;;  %s1106_s5 = sshll.u32 %s1553_s14, 6 }
  0x83   : > { %p2124_p9 = scmp.eq.s32.totalorder %s1670_s16, 0  ;;  %s1105_s20 = sshll.u32 %s353_s19, 2 }
  0x84   : > { %s1878_s7 = scalar_lea.hbm %s2061_s2, %s1106_s5  ;;  %s355_s25 = scalar_lea.vmem [#allocation8], %s1105_s20 }
  0x85   : > { %p1871_p5 = por %p125_p10, %p2124_p9  ;;  %s363_s24 = sshll.u32 %s355_s25, 4  ;;  %s364_s24 = int_to_ptr.vmem [resolvable:$true] %s363_s24 }
  0x86   : > { %p2126_p13 = scmp.lt.s32.totalorder %s1557_s15, 24  ;;  %s1393_s11 = scalar_lea.hbm %s1878_s7, 64 }
  0x87   : > { %s2125_s30 = scalar_select %p1871_p5, 1, 0 }
  0x88   : > { %p1882_p0 = pnand %p2126_p13, %p121_p3  ;;  %p1394_p8 = scmp.ne.s32.totalorder %s1878_s7, %s1393_s11 }
  0x89   : > { %s1398_s21 = scalar_lea.hbm %s2061_s2, 128  ;;  %p1399_p6 = scmp.lt.u32.totalorder %s1878_s7, %s2061_s2 }
  0x8a   : > { %p1395_p1 = pneg %p1882_p0  ;;  %p1400_p4 = scmp.lt.u32.totalorder %s1398_s21, %s1393_s11 }
  0x8b   : > { %p1402_p12 = scmp.lt.u32.totalorder %s1393_s11, %s1878_s7 }
  0x8c   : > { %p1396_p2 = pnand %p1395_p1, %p1394_p8  ;;  %p1401_p7 = por %p1400_p4, %p1399_p6 }
  0x8e   : > { %p1397_p11 = pneg %p1396_p2  ;;  %p1403_p3 = por %p1402_p12, %p1401_p7 }
  0x90   : > { %p1404_p10 = pnand %p1403_p3, %p1397_p11 }
  0x92   : > { %1407 = shalt.err (!%p1404_p10)
}
  0x93   : > { %s1408_s12 = scalar_lea.vmem %s364_s24, 64  ;;  %s1564_s23 = smov [#allocation8]  }
  0x94   : > { %p1409_p9 = scmp.ne.s32.totalorder %s364_s24, %s1408_s12  ;;  %s1413_s19 = sshll.u32 %s1564_s23, 4  ;;  %s1414_s19 = int_to_ptr.vmem [resolvable:$false] %s1413_s19 }
  0x95   : > { %s1415_s5 = scalar_lea.vmem %s1414_s19, 128  ;;  %p1416_p2 = scmp.lt.s32.totalorder %s364_s24, %s1414_s19 }
  0x96   : > { %p1411_p13 = pnand %p1409_p9, %p1395_p1  ;;  %p1417_p5 = scmp.lt.s32.totalorder %s1415_s5, %s1408_s12 }
  0x98   : > { %p1412_p8 = pneg %p1411_p13  ;;  %p1418_p4 = por %p1417_p5, %p1416_p2 }
  0x9a   : > { %p1419_p6 = pnand %p1418_p4, %p1412_p8 }
  0x9c   : > { %1422 = shalt.err (!%p1419_p6)
}
  0x9d   : > { %1179 = dma.hbm_to_vmem [thread:$0]  (!%p1882_p0), %s1878_s7, 64, %s364_s24, %s1745_s13  }
  0x9e   : > { %p2128_p11 = scmp.ne.s32.totalorder %s2115_s26, 0 }
  0x9f   : > { %s2129_s20 = sld [smem:[#allocation26_spill]] (!%p2128_p11)  ;;  %s1911_s6 = sand.u32 (!%p2128_p11), 1, %s1533_s9  }
  0xa0   : > { %382 = sbr.rel (%p2128_p11) target bundleno = 1182 (0x49e), region = 52  ;;  %s1914_s18 = sshll.u32 (!%p2128_p11), %s1911_s6, 3 }
  0xa1   : > { %s385_s25 = scalar_lea.sflag (!%p2128_p11), [#allocation4], %s1911_s6  ;;  %s388_s11 = scalar_lea.vmem (!%p2128_p11), [#allocation3], %s1914_s18 }
  0xa5   : > { %p2130_p5 = scmp.ne.s32.totalorder (!%p2128_p11), %s2129_s20, 0 }
  0xa7   : > { %1496 = dma.done.wait (%p2130_p5), %s385_s25, 128  }
  0xa8   : > { %1498 = vsyncadd (%p2130_p5), %s385_s25, 4294967168  ;;  %s393_s13 = sand.u32 1, %s1670_s16   ;;  %s397_s7 = scalar_lea.vmem [#allocation6], %s1914_s18 }
  0xa9   : > { %s394_s26 = scalar_lea.sflag [#allocation7], %s393_s13 }
  0xaa   : > { %1500 = dma.done.wait (%p2130_p5), %s394_s26, 128  }
  0xab   : > { %1502 = vsyncadd (%p2130_p5), %s394_s26, 4294967168  ;;  %s404_s24 = sand.u32 1, %s1521_s28   ;;  %p2131_p0 = scmp.ne.s32.totalorder %s2125_s30, 0 }
  0xac   : > { %s1110_s27 = sshll.u32 %s404_s24, 2 }
  0xad   : > { %s406_s22 = scalar_lea.vmem [#allocation8], %s1110_s27 }
  0xae   : > { %1504 = dma.done.wait (%p2131_p0), %s394_s26, 64  }
  0xaf   : > { %1506 = vsyncadd (%p2131_p0), %s394_s26, 4294967232  ;;  %p2132_p1 = scmp.eq.s32.totalorder %s1670_s16, 0 }
  0xb1   : > { %1508 = dma.done.wait (%p2132_p1), [#allocation10], 256   ;;  %p2133_p7 = pmov %p2132_p1 }
  0xb2   : > { %vm472_vm0 = vcmask 261120   ;;  %v531_v0 = vlaneseq  ;;  %v1565_v1 = vmov 0.0   ;;  %vm1566_vm1 = vmmov 0   ;;  %v475_v9 = vld [vmem:[%s406_s22] sm:$0xf]  ;;  %v474_v10 = vld [vmem:[%s397_s7] sm:$0xff] }
  0xb3   : > { %1510 = vsyncadd (%p2133_p7), [#allocation10], 4294967040  ;;  %1134 = vmatprep.subr.bf16.mxu0 %v1565_v1  ;;  %473 = vst.msk [vmem:[#allocation2] sm:$0xff] %vm472_vm0, %v1565_v1  ;;  %1136 = vmatprep.mubr.msk.bf16.mxu0 %vm1566_vm1, %v1565_v1  ;;  %v1567_v2 = vmov 1966171168   ;;  %v483_v11 = vsel %vm472_vm0, %v475_v9, 0  ;;  %v527_v14 = vcombine.high %v474_v10, %v474_v10  ;;  %v525_v15 = vunpack.c.l.bf16 %v475_v9 }
  0xb4   : > { %v529_v3 = vunpack.c.l.s4 %v1567_v2  ;;  %v532_v4 = vshrl.u32 %v531_v0, 7  ;;  %v714_v5 = vand.u32 127, %v531_v0  ;;  %1140 = vmatprep.subr.bf16.mxu1 %v1565_v1  ;;  %1142 = vmatprep.mubr.msk.bf16.mxu1 %vm1566_vm1, %v1565_v1  ;;  %v477_v19 = vpack.c.bf16 %v474_v10, %v474_v10  ;;  %s2134_s16 = sld [smem:[#allocation19_spill]]  ;;  %s2135_s1 = sld [smem:[#allocation28_spill]] }
  0xb5   : > { %1135 = vmatpush3.bf16.xpose.msra.mxu0 %v483_v11  ;;  %vm769_vm2 = vcmask 1043456   ;;  %vm747_vm3 = vcmask 1041409   ;;  %vm749_vm4 = vcmask 1042434   ;;  %vm751_vm5 = vcmask 1043459   ;;  %s2136_s5 = sld [smem:[#allocation29_spill]]  ;;  %s2137_s20 = sld [smem:[#allocation18_spill]] }
  0xb6   : > { %v530_v6 = vunpack.c.0.s8 %v529_v3  ;;  %v1945_v7 = vsub.s32 %v714_v5, %v532_v4  ;;  %v578_v13 = vsub.s32 0, %v532_v4  ;;  %vm753_vm6 = vcmask 1044484   ;;  %s2138_s13 = sld [smem:[#allocation23_spill]]  ;;  %s2139_s24 = sld [smem:[#allocation30_spill]] }
  0xb7   : > { %vm755_vm7 = vcmask 1045509   ;;  %vm757_vm8 = vcmask 1046534   ;;  %vm759_vm9 = vcmask 1047559   ;;  %vm765_vm10 = vcmask 64512   ;;  %s459_s21 = scalar_lea.vmem [#allocation11], %s1914_s18  ;;  %s2141_s23 = sld [smem:[#allocation32_spill]] }
  0xb8   : > { %v533_v8 = vsub.s32 %v530_v6, %v532_v4  ;;  %s935_s17 = sshll.u32 %s459_s21, 4  ;;  %s920_s19 = scalar_lea.sflag [#allocation5], %s1911_s6  ;;  %s1997_s17 = int_to_ptr.vmem [resolvable:$true] %s935_s17 }
  0xb9   : > { %s1568_s18 = smov [#allocation11]  }
  0xba   : > { %v534_v12 = vrot.slane %v474_v10, %v533_v8  ;;  %v541_v18 = vrot.slane %v527_v14, %v533_v8  ;;  %p460_p12 = scmp.lt.s32.totalorder %s2134_s16, 1 }
  0xbb   : > { %s1123_s25 = sshll.u32 %s2137_s20, 1  ;;  %s1427_s20 = sshll.u32 %s1568_s18, 4  ;;  %s1428_s20 = int_to_ptr.vmem [resolvable:$false] %s1427_s20 }
  0xbc   : > { %v550_v16 = vrot.slane %v534_v12, %v533_v8  ;;  %v542_v17 = vcombine.high %v534_v12, %v534_v12  ;;  %v557_v23 = vrot.slane %v541_v18, %v533_v8  ;;  %v543_v24 = vcombine.high %v541_v18, %v541_v18  ;;  %1137 = vmatmul.mubr.msk.bf16.vlgmr.msra.gmra.mrb[0].mxu0 %vm472_vm0, %v477_v19  ;;  %s461_s30 = scalar_select %p460_p12, %s2134_s16, 1 }
  0xbd   : > { %p2142_p10 = scmp.ne.s32.totalorder %s2138_s13, 0  ;;  %p1430_p8 = scmp.lt.s32.totalorder %s1997_s17, %s1428_s20 }
  0xbe   : > { %v579_v20 = vrot.slane %v550_v16, %v578_v13  ;;  %v572_v21 = vcombine.high %v550_v16, %v550_v16  ;;  %v564_v22 = vrot.slane %v542_v17, %v533_v8  ;;  %v595_v29 = vrot.slane %v557_v23, %v578_v13  ;;  %s1113_s8 = sshll.u32 %s461_s30, 2  ;;  %s2140_s30 = sld [smem:[#allocation31_spill]] }
  0xbf   : > { %v571_v30 = vrot.slane %v543_v24, %v533_v8  ;;  %v573_v31 = vcombine.high %v557_v23, %v557_v23  ;;  %s466_s12 = scalar_lea.vmem %s2135_s1, %s1113_s8 }
  0xc0   : > { %v616_v25 = vsub.f32 %v579_v20, %v525_v15  ;;  %v587_v26 = vrot.slane %v572_v21, %v578_v13  ;;  %v583_v27 = vrot.slane %v564_v22, %v578_v13  ;;  %v574_v28 = vcombine.high %v564_v22, %v564_v22  ;;  %v476_v60 = vld [vmem:[%s466_s12] sm:$0xf] }
  0xc1   : > { %v620_v36 = vsub.f32 %v595_v29, %v525_v15  ;;  %v599_v37 = vrot.slane %v571_v30, %v578_v13  ;;  %v603_v38 = vrot.slane %v573_v31, %v578_v13  ;;  %v575_v39 = vcombine.high %v571_v30, %v571_v30 }
  0xc2   : > { %v624_v32 = vand.u32 2147483647, %v616_v25  ;;  %v618_v33 = vsub.f32 %v587_v26, %v525_v15  ;;  %v617_v34 = vsub.f32 %v583_v27, %v525_v15  ;;  %v591_v35 = vrot.slane %v574_v28, %v578_v13 }
  0xc3   : > { %v628_v44 = vand.u32 2147483647, %v620_v36  ;;  %v621_v45 = vsub.f32 %v599_v37, %v525_v15  ;;  %v607_v46 = vrot.slane %v575_v39, %v578_v13  ;;  %v622_v50 = vsub.f32 %v603_v38, %v525_v15 }
  0xc4   : > { %v632_v40 = vsel %vm472_vm0, %v624_v32, 0.0  ;;  %v626_v41 = vand.u32 2147483647, %v618_v33  ;;  %v625_v42 = vand.u32 2147483647, %v617_v34  ;;  %v619_v43 = vsub.f32 %v591_v35, %v525_v15 }
  0xc5   : > { %633 = vadd.xlane.f32.xlu0 %v632_v40  ;;  %v629_v52 = vand.u32 2147483647, %v621_v45  ;;  %v623_v53 = vsub.f32 %v607_v46, %v525_v15  ;;  %v644_v54 = vsel %vm472_vm0, %v628_v44, 0.0  ;;  %v630_v55 = vand.u32 2147483647, %v622_v50 }
  0xc6   : > { %v638_v47 = vsel %vm472_vm0, %v626_v41, 0.0  ;;  %v635_v48 = vsel %vm472_vm0, %v625_v42, 0.0  ;;  %v627_v49 = vand.u32 2147483647, %v619_v43  ;;  %v771_v61 = vsel %vm769_vm2, %v476_v60, 0 }
  0xc7   : > { %639 = vadd.xlane.f32.xlu1 %v638_v47  ;;  %v647_v56 = vsel %vm472_vm0, %v629_v52, 0.0  ;;  %v631_v57 = vand.u32 2147483647, %v623_v53  ;;  %v650_v58 = vsel %vm472_vm0, %v630_v55, 0.0  ;;  %1141 = vmatpush3.bf16.msra.mxu1 %v771_v61 }
  0xc8   : > { %v641_v51 = vsel %vm472_vm0, %v627_v49, 0.0  ;;  %1146 = vmatprep.subr.bf16.mxu1 %v1565_v1 }
  0xc9   : > { %636 = vadd.xlane.f32.xlu0 %v635_v48  ;;  %v653_v59 = vsel %vm472_vm0, %v631_v57, 0.0 }
  0xcb   : > { %642 = vadd.xlane.f32.xlu1 %v641_v51 }
  0xcd   : > { %645 = vadd.xlane.f32.xlu0 %v644_v54 }
  0xcf   : > { %648 = vadd.xlane.f32.xlu1 %v647_v56 }
  0xd1   : > { %651 = vadd.xlane.f32.xlu0 %v650_v58 }
  0xd3   : > { %654 = vadd.xlane.f32.xlu1 %v653_v59 }
 0x152   : > { %v634_v62 = vpop.xlane.xlu0 %633 }
 0x153   : > { %v664_v0 = vmul.f32 -1.0, %v634_v62 }
 0x154   : > { %v640_v63 = vpop.xlane.xlu1 %639 }
 0x155   : > { %v673_v4 = vmul.f32 0.5, %v664_v0  ;;  %v666_v5 = vmul.f32 -1.0, %v640_v63 }
 0x156   : > { %v637_v2 = vpop.xlane.xlu0 %636 }
 0x157   : > { %v665_v3 = vmul.f32 -1.0, %v637_v2  ;;  %1285 = vtanh.f32 %v673_v4  ;;  %v675_v11 = vmul.f32 0.5, %v666_v5 }
 0x158   : > { %v643_v6 = vpop.xlane.xlu1 %642 }
 0x159   : > { %v674_v8 = vmul.f32 0.5, %v665_v3  ;;  %v667_v9 = vmul.f32 -1.0, %v643_v6 }
 0x15a   : > { %v646_v10 = vpop.xlane.xlu0 %645 }
 0x15b   : > { %1287 = vtanh.f32 %v674_v8  ;;  %v668_v12 = vmul.f32 -1.0, %v646_v10  ;;  %v676_v14 = vmul.f32 0.5, %v667_v9  ;;  %v1283_v8 = vld [vmem:[#allocation9] sm:$0xff]   ;;  %v1284_v9 = vld [vmem:[#allocation9 + $0x8] sm:$0xff]   ;;  %v763_v10 = vld [vmem:[#allocation2] sm:$0xff] }
 0x15c   : > { %v649_v13 = vpop.xlane.xlu1 %648  ;;  %1289 = vtanh.f32 %v675_v11 }
 0x15d   : > { %v669_v15 = vmul.f32 -1.0, %v649_v13  ;;  %v677_v17 = vmul.f32 0.5, %v668_v12  ;;  %1291 = vtanh.f32 %v676_v14 }
 0x15e   : > { %v652_v16 = vpop.xlane.xlu0 %651 }
 0x15f   : > { %v670_v18 = vmul.f32 -1.0, %v652_v16  ;;  %v678_v20 = vmul.f32 0.5, %v669_v15  ;;  %1293 = vtanh.f32 %v677_v17  ;;  %v1116_v17 = vld [vmem:[%s2136_s5] ss:$0 sm:$0xff]  ;;  %s1423_s5 = scalar_lea.vmem %s1997_s17, 128 }
 0x160   : > { %v655_v19 = vpop.xlane.xlu1 %654  ;;  %p1424_p3 = scmp.ne.s32.totalorder %s1997_s17, %s1423_s5 }
 0x161   : > { %v1286_v21 = vpop.eup %1285  ;;  %v671_v23 = vmul.f32 -1.0, %v655_v19  ;;  %v679_v24 = vmul.f32 0.5, %v670_v18  ;;  %1295 = vtanh.f32 %v678_v20 }
 0x162   : > { %v689_v26 = vadd.f32 1.0, %v1286_v21  ;;  %p1425_p9 = pnand %p1424_p3, %p2142_p10 }
 0x163   : > { %v680_v28 = vmul.f32 0.5, %v671_v23  ;;  %1297 = vtanh.f32 %v679_v24 }
 0x164   : > { %v697_v31 = vmul.f32 0.5, %v689_v26  ;;  %p1426_p13 = pneg %p1425_p9 }
 0x165   : > { %v1288_v22 = vpop.eup %1287  ;;  %1299 = vtanh.f32 %v680_v28 }
 0x166   : > { %v1290_v25 = vpop.eup %1289  ;;  %v690_v27 = vadd.f32 1.0, %v1288_v22  ;;  %v718_v36 = vrot.slane %v697_v31, %v1945_v7 }
 0x167   : > { %v1292_v29 = vpop.eup %1291  ;;  %v691_v30 = vadd.f32 1.0, %v1290_v25 }
 0x168   : > { %v698_v32 = vmul.f32 0.5, %v690_v27  ;;  %v692_v34 = vadd.f32 1.0, %v1292_v29 }
 0x169   : > { %v1294_v33 = vpop.eup %1293  ;;  %v699_v35 = vmul.f32 0.5, %v691_v30 }
 0x16a   : > { %v722_v37 = vrot.slane %v698_v32, %v1945_v7  ;;  %v693_v39 = vadd.f32 1.0, %v1294_v33  ;;  %v700_v40 = vmul.f32 0.5, %v692_v34  ;;  %v1120_v34 = vld [vmem:[%s2139_s24] ss:$0 sm:$0xff] }
 0x16b   : > { %v1296_v38 = vpop.eup %1295  ;;  %v726_v41 = vrot.slane %v699_v35, %v1945_v7 }
 0x16c   : > { %v748_v43 = vsel %vm747_vm3, %v722_v37, %v718_v36  ;;  %v694_v44 = vadd.f32 1.0, %v1296_v38  ;;  %v701_v45 = vmul.f32 0.5, %v693_v39  ;;  %v730_v46 = vrot.slane %v700_v40, %v1945_v7  ;;  %v1121_v36 = vld [vmem:[%s2140_s30] ss:$0 sm:$0xff] }
 0x16d   : > { %v1298_v42 = vpop.eup %1297  ;;  %v750_v48 = vsel %vm749_vm4, %v726_v41, %v748_v43 }
 0x16e   : > { %v695_v49 = vadd.f32 1.0, %v1298_v42  ;;  %v702_v50 = vmul.f32 0.5, %v694_v44  ;;  %v734_v51 = vrot.slane %v701_v45, %v1945_v7  ;;  %v752_v52 = vsel %vm751_vm5, %v730_v46, %v750_v48 }
 0x16f   : > { %v1300_v47 = vpop.eup %1299 }
 0x170   : > { %v696_v53 = vadd.f32 1.0, %v1300_v47  ;;  %v703_v54 = vmul.f32 0.5, %v695_v49  ;;  %v738_v56 = vrot.slane %v702_v50, %v1945_v7  ;;  %v754_v58 = vsel %vm753_vm6, %v734_v51, %v752_v52 }
 0x172   : > { %v704_v60 = vmul.f32 0.5, %v696_v53  ;;  %v742_v62 = vrot.slane %v703_v54, %v1945_v7  ;;  %v756_v63 = vsel %vm755_vm7, %v738_v56, %v754_v58 }
 0x174   : > { %v746_v0 = vrot.slane %v704_v60, %v1945_v7  ;;  %v758_v2 = vsel %vm757_vm8, %v742_v62, %v756_v63 }
 0x176   : > { %v760_v4 = vsel %vm759_vm9, %v746_v0, %v758_v2 }
 0x18f   : > { %v519_v55 = vpop.f32.mrb[0].mxu0 }
 0x190   : > { %1301 = vtanh.f32 %v519_v55  ;;  %v1138_v57 = vpop.f32.mrb[1].mxu0 }
 0x191   : > { %v522_v59 = vpop.f32.mrb[2].mxu0 }
 0x192   : > { %v1139_v61 = vpop.f32.mrb[3].mxu0 }
 0x19a   : > { %v1302_v3 = vpop.eup %1301 }
 0x19b   : > { %v762_v5 = vmul.f32 %v1302_v3, %v760_v4 }
 0x19d   : > { %v764_v6 = vpack.c.bf16 %v762_v5, %v762_v5 }
 0x19f   : > { %1143 = vmatmul.mubr.msk.bf16.vlgmr.msra.gmra.mrb[0].mxu1 %vm765_vm10, %v764_v6 }
 0x1a0   : > { %1150 = vmatprep.mubr.msk.bf16.mxu1 %vm1566_vm1, %v1565_v1  ;;  %1147 = vmatpush3.bf16.msra.mxu1 %v1283_v8 }
 0x1a1   : > { %1148 = vmatprep.subr.bf16.mxu1 %v1565_v1  ;;  %v818_v1 = vld [vmem:[%s388_s11] sm:$0xff]  ;;  %s931_s11 = sadd.s32 %s2134_s16, %s1123_s25  ;;  %s1429_s25 = scalar_lea.vmem %s1428_s20, 256 }
 0x1a2   : > { %s1124_s8 = sshll.u32 %s931_s11, 7  ;;  %p1431_p2 = scmp.lt.s32.totalorder %s1429_s25, %s1423_s5 }
 0x1a3   : > { %s1995_s16 = scalar_lea.hbm %s2141_s23, %s1124_s8 }
 0x1a4   : > { %1149 = vmatpush3.bf16.msra.mxu1 %v1284_v9  ;;  %p1432_p4 = por %p1431_p2, %p1430_p8 }
 0x1a6   : > { %p1433_p6 = pnand %p1432_p4, %p1426_p13 }
 0x272   : > { %v807_v7 = vpop.f32.mrb[0].mxu1 }
 0x273   : > { %v813_v11 = vadd.f32 %v807_v7, %v763_v10  ;;  %v1144_v12 = vpop.f32.mrb[1].mxu1 }
 0x274   : > { %v810_v13 = vpop.f32.mrb[2].mxu1 }
 0x275   : > { %814 = vst.msk [vmem:[#allocation2] sm:$0xff] %vm472_vm0, %v813_v11  ;;  %v1145_v14 = vpop.f32.mrb[3].mxu1 }
 0x27c   : > { %v819_v15 = vld [vmem:[#allocation2] sm:$0xff] }
 0x27d   : > { %v820_v16 = vpack.c.bf16 %v819_v15, %v819_v15 }
 0x27f   : > { %1151 = vmatmul.mubr.msk.bf16.vlgmr.msra.gmra.mrb[4].mxu1 %vm472_vm0, %v820_v16 }
 0x352   : > { %v881_v18 = vpop.f32.mrb[4].mxu1 }
 0x353   : > { %v882_v19 = vadd.f32 %v1116_v17, %v881_v18  ;;  %v1152_v20 = vpop.f32.mrb[5].mxu1 }
 0x354   : > { %v884_v21 = vpop.f32.mrb[6].mxu1 }
 0x355   : > { %v1153_v22 = vpop.f32.mrb[7].mxu1  ;;  %v887_v23 = vadd.f32 %v882_v19, %v818_v1 }
 0x357   : > { %v888_v24 = vsel %vm472_vm0, %v887_v23, 0.0 }
 0x358   : > { %889 = vadd.xlane.f32.xlu0 %v888_v24 }
 0x3e5   : > { %v890_v25 = vpop.xlane.xlu0 %889 }
 0x3e6   : > { %v892_v26 = vmul.f32 0.03125, %v890_v25 }
 0x3e8   : > { %v893_v27 = vsub.f32 %v887_v23, %v892_v26 }
 0x3ea   : > { %v894_v28 = vmul.f32 %v893_v27, %v893_v27 }
 0x3ec   : > { %v895_v29 = vsel %vm472_vm0, %v894_v28, 0.0 }
 0x3ed   : > { %896 = vadd.xlane.f32.xlu1 %v895_v29 }
 0x47a   : > { %v897_v30 = vpop.xlane.xlu1 %896 }
 0x47b   : > { %v898_v31 = vmul.f32 0.03125, %v897_v30 }
 0x47d   : > { %v899_v32 = vadd.f32 1e-05, %v898_v31 }
 0x47f   : > { %1303 = vrsqrt.f32 %v899_v32 }
 0x489   : > { %v1304_v33 = vpop.eup %1303 }
 0x48a   : > { %v901_v35 = vmul.f32 %v1304_v33, %v893_v27 }
 0x48c   : > { %v909_v37 = vmul.f32 %v1120_v34, %v901_v35 }
 0x48e   : > { %v917_v38 = vadd.f32 %v1121_v36, %v909_v37 }
 0x490   : > { %918 = vst.msk [vmem:[%s459_s21] sm:$0xff] %vm472_vm0, %v917_v38 }
 0x491   : > { %1436 = shalt.err (!%p1433_p6)
}
 0x492   : > { %s1437_s6 = scalar_lea.hbm %s1995_s16, 128  ;;  %s1441_s7 = scalar_lea.hbm %s2141_s23, 3072 }
 0x493   : > { %p1438_p11 = scmp.ne.s32.totalorder %s1995_s16, %s1437_s6  ;;  %p1442_p1 = scmp.lt.u32.totalorder %s1995_s16, %s2141_s23 }
 0x494   : > { %p1443_p7 = scmp.lt.u32.totalorder %s1441_s7, %s1437_s6  ;;  %p1445_p3 = scmp.lt.u32.totalorder %s1437_s6, %s1995_s16 }
 0x495   : > { %p1439_p5 = pnand %p1438_p11, %p2142_p10 }
 0x496   : > { %p1444_p12 = por %p1443_p7, %p1442_p1 }
 0x497   : > { %p1440_p0 = pneg %p1439_p5 }
 0x498   : > { %p1446_p9 = por %p1445_p3, %p1444_p12 }
 0x49a   : > { %p1447_p13 = pnand %p1446_p9, %p1440_p0 }
 0x49c   : > { %1450 = shalt.err (!%p1447_p13)
}
 0x49d   : > { %1164 = dma.vmem_to_hbm [thread:$0]  (%p2142_p10), %s1997_s17, 128, %s1995_s16, %s920_s19  }
 0x49e PF: > { %s2143_s22 = sld [smem:[#allocation17_spill]]  ;;  %s2144_s30 = sld [smem:[#allocation24_spill]] }
 0x49f   : > { %p1187_p8 = scmp.ge.s32.totalorder %s1557_s15, 2 }
 0x4a4   : > { %s947_s8 = sand.u32 1, %s2143_s22   ;;  %p2145_p2 = scmp.ne.s32.totalorder %s2144_s30, 0 }
 0x4a5   : > { %s948_s21 = scalar_lea.sflag [#allocation5], %s947_s8 }
 0x4a6   : > { %p1181_p4 = pnand %p1187_p8, %p2145_p2 }
 0x4a8   : > { %1512 = dma.done.wait (!%p1181_p4), %s948_s21, 128  }
 0x4a9   : > { %1514 = vsyncadd (!%p1181_p4), %s948_s21, 4294967168  ;;  %s28_s15 = sadd.s32 1, %s1557_s15   ;;  %s2146_s13 = sld [smem:[#allocation25_spill]] }
 0x4aa   : > { %p25_p6 = scmp.ge.s32.totalorder %s28_s15, 26   ;;  %s2147_s11 = sld [smem:[#allocation20_spill]] }
 0x4ab   : > { %s2148_s17 = sld [smem:[#allocation21_spill]]  ;;  %s2149_s1 = sld [smem:[#allocation22_spill]] }
 0x4ac   : > { %s2150_s27 = smov %s1521_s28  ;;  %s2151_s28 = smov %s1525_s29 }
 0x4ad   : > { %s2152_s29 = smov %s1861_s3  ;;  %s2153_s30 = smov %s1533_s9 }
 0x4ae   : > { %s2154_s9 = smov %s1537_s10  ;;  %s2156_s12 = smov %s1553_s14 }
 0x4af   : > { %s2155_s10 = smov %s2146_s13  ;;  %27 = sbr.rel (!%p25_p6) target bundleno = 19 (0x13), region = 136 }
 0x4b1   : > { %s2157_s13 = smov %s2148_s17  ;;  %s2158_s14 = smov %s2149_s1 }
 0x4b6   :  { %953 = vsyncpa [#allocation4], 1 }
 0x4b7   :  { %955 = vsyncpa [#allocation4 + $0x1], 1 }
 0x4b8   :  { %956 = vsyncpa [#allocation7], 1 }
 0x4b9   :  { %958 = vsyncpa [#allocation7 + $0x1], 1 }
 0x4ba   :  { %959 = vsyncpa [#allocation10], 1 }
 0x4bb   :  { %960 = vsyncpa [#allocation5], 1 }
 0x4bc   :  { %962 = vsyncpa [#allocation5 + $0x1], 1 }

</bundles_post_ra>
